<compile_context>
chip_gen: v5e
topology: v5e:2x2
jax: 0.10.0
libtpu: 0.0.40
codegen_flags: <defaults>
</compile_context>

<pallas_src>
import jax
import jax.numpy as jnp
from jax.experimental import pallas as pl
from jax.experimental.pallas import tpu as pltpu

TEMPERATURE = 1.0  # module hyper-parameter
_MIB = 1024 * 1024


def _cdiv(a, b):
    return -(-a // b)


def _adaptive_attention_kernel(scale_ref, q_ref, k_ref, v_ref, o_ref,
                               m_sc, l_sc, acc_sc):
    # Grid: (bh blocks [parallel], kv blocks [arbitrary / reduction]).
    # q/o blocks: (T, S, D); k/v blocks: (T, Skv, D).
    kv = pl.program_id(1)

    @pl.when(kv == 0)
    def _():
        m_sc[...] = jnp.full_like(m_sc, -jnp.inf)
        l_sc[...] = jnp.zeros_like(l_sc)
        acc_sc[...] = jnp.zeros_like(acc_sc)

    scale = scale_ref[0]  # alpha / temperature (SMEM scalar)

    # Fold alpha/temperature into q (SxD work instead of SxS); the adaptive
    # mean blend cancels under softmax (per-row constant shift).
    q = (q_ref[...].astype(jnp.float32) * scale).astype(q_ref.dtype)   # (T,S,D)

    # Batched q @ k^T contracting last dims -> no explicit transpose of k.
    s = jnp.einsum("bqd,bkd->bqk", q, k_ref[...],
                   preferred_element_type=jnp.float32)                 # (T,S,Skv)

    # TODO(synk): optional `mask` argument (masked_fill(mask==0, -inf)) is not
    # wired in; the module's default path (mask=None) is implemented here.

    # Online (flash-style) softmax update.
    m_new = jnp.maximum(m_sc[...], jnp.max(s, axis=-1, keepdims=True))
    a = jnp.exp(m_sc[...] - m_new)                                     # (T,S,1)
    p = jnp.exp(s - m_new)                                             # (T,S,Skv)
    l_sc[...] = a * l_sc[...] + jnp.sum(p, axis=-1, keepdims=True)
    acc_sc[...] = a * acc_sc[...] + jnp.einsum(
        "bqk,bkd->bqd", p.astype(v_ref.dtype), v_ref[...],
        preferred_element_type=jnp.float32)
    m_sc[...] = m_new

    @pl.when(kv == pl.num_programs(1) - 1)
    def _():
        # Deferred, exact normalization: one (T,S,D) divide instead of a
        # (T,S,S) multiply by an approximate reciprocal.
        o_ref[...] = (acc_sc[...] / l_sc[...]).astype(o_ref.dtype)


def _vmem_capacity_bytes():
    try:
        cap = int(pltpu.get_tpu_info().vmem_capacity_bytes)
        if 16 * _MIB <= cap <= 1024 * _MIB:
            return cap
    except Exception:
        pass
    return 64 * _MIB  # conservative default (v7x: 64 MiB per TensorCore)


def _tensorcores_per_chip():
    try:
        kind = jax.devices()[0].device_kind.lower()
    except Exception:
        return 2
    # v5e / v6e: single TensorCore per chip; v4/v5p/v7x: two.
    if "v5 lite" in kind or "v5e" in kind or "v5litepod" in kind or "v6" in kind:
        return 1
    return 2


def _pick_tiles(bh, s, d, itemsize, budget, num_cores):
    """Choose (bh_tile, kv_tile) so the working set stays within `budget`."""
    sub = {4: 8, 2: 16, 1: 32}.get(itemsize, 8)   # sublane granularity

    def footprint(t, skv):
        blocks = 2 * t * s * d * itemsize                 # q   (double-buffered)
        blocks += 2 * 2 * t * skv * d * itemsize          # k,v (double-buffered)
        blocks += 2 * t * s * d * itemsize                # out (double-buffered)
        scratch = t * s * d * 4 + 2 * t * s * 4           # acc + m + l (f32)
        temps = 5 * t * s * skv * 4 + 2 * t * s * d * 4   # live f32 temporaries
        return blocks + scratch + temps

    # KV tile: full S if a single head fits, otherwise the largest divisor of S
    # that is a multiple of the sublane size and fits the budget.
    kv = s
    if footprint(1, s) > budget:
        for c in sorted((c for c in range(sub, s, sub) if s % c == 0),
                        reverse=True):
            if footprint(1, c) <= budget:
                kv = c
                break
        else:
            kv = sub if (s % sub == 0 and s > sub) else s  # last resort
        # TODO(synk): also tile the query axis for extreme S where even a
        # single (1, S, D) q/acc block overflows VMEM.

    bh_tile = max(1, min(bh, budget // max(footprint(1, kv), 1)))

    # Megacore: on 2-TC chips keep >=2 (and an even number of) steps on the
    # parallel axis so both cores get equal work; no constraint on 1-TC chips.
    if num_cores >= 2 and bh >= 2:
        bh_tile = min(bh_tile, _cdiv(bh, 2))
        steps = _cdiv(bh, bh_tile)
        if steps % 2 and steps < bh:
            bh_tile = _cdiv(bh, steps + 1)
    return bh_tile, kv


def adaptive_attention(q, k, v, alpha, temperature=TEMPERATURE):
    """q, k, v: [B, H, S, D]. alpha: scalar. Returns [B, H, S, D]."""
    B, H, S, D = q.shape
    BH = B * H
    qf = q.reshape(BH, S, D)
    kf = k.reshape(BH, S, D)
    vf = v.reshape(BH, S, D)

    # Generation-aware VMEM sizing (v5e/v6e: 128 MiB; v7x: 64 MiB per TC).
    cap = _vmem_capacity_bytes()
    vmem_limit = max(32 * _MIB, min(int(cap * 0.8), cap - 8 * _MIB))
    budget = max(8 * _MIB, vmem_limit - 4 * _MIB)   # headroom for Mosaic scratch

    bh_tile, kv_tile = _pick_tiles(BH, S, D, q.dtype.itemsize, budget,
                                   _tensorcores_per_chip())

    # Pad BH so awkward B*H values don't collapse the tile size.
    grid_bh = _cdiv(BH, bh_tile)
    bh_pad = grid_bh * bh_tile
    if bh_pad != BH:
        pad = ((0, bh_pad - BH), (0, 0), (0, 0))
        qf, kf, vf = jnp.pad(qf, pad), jnp.pad(kf, pad), jnp.pad(vf, pad)

    if S % kv_tile:          # safety net: fall back to a single full-S KV pass
        kv_tile = S
    n_kv = S // kv_tile
    grid = (grid_bh, n_kv)

    # alpha/temperature folded into a single SMEM scalar.
    scale = (jnp.asarray(alpha, jnp.float32) /
             jnp.float32(temperature)).reshape(1)

    # TODO(synk): for D < 128 (lane-sparse output) a head-packed, lane-dense
    # output layout would avoid masked partial stores; not done here.
    out = pl.pallas_call(
        _adaptive_attention_kernel,
        out_shape=jax.ShapeDtypeStruct((bh_pad, S, D), q.dtype),
        grid=grid,
        in_specs=[
            pl.BlockSpec(memory_space=pltpu.SMEM),                        # scale
            pl.BlockSpec((bh_tile, S, D), lambda i, j: (i, 0, 0)),        # q
            pl.BlockSpec((bh_tile, kv_tile, D), lambda i, j: (i, j, 0)),  # k
            pl.BlockSpec((bh_tile, kv_tile, D), lambda i, j: (i, j, 0)),  # v
        ],
        out_specs=pl.BlockSpec((bh_tile, S, D), lambda i, j: (i, 0, 0)),
        scratch_shapes=[
            pltpu.VMEM((bh_tile, S, 1), jnp.float32),   # running max
            pltpu.VMEM((bh_tile, S, 1), jnp.float32),   # running denom
            pltpu.VMEM((bh_tile, S, D), jnp.float32),   # unnormalized acc
        ],
        compiler_params=pltpu.CompilerParams(
            dimension_semantics=("parallel", "arbitrary"),
            vmem_limit_bytes=int(vmem_limit),
        ),
    )(scale, qf, kf, vf)

    if bh_pad != BH:
        out = out[:BH]
    return out.reshape(B, H, S, D)


def adaptive_attention_ref(q, k, v, alpha, temperature=TEMPERATURE):
    # Full original formula (including the redundant mean blend) for validation.
    scores = jnp.einsum("bhqd,bhkd->bhqk", q, k,
                        precision=jax.lax.Precision.HIGHEST) / temperature
    adaptive = alpha * scores + (1.0 - alpha) * jnp.mean(scores, axis=-1,
                                                         keepdims=True)
    attn = jax.nn.softmax(adaptive, axis=-1)
    return jnp.einsum("bhqk,bhkd->bhqd", attn, v,
                      precision=jax.lax.Precision.HIGHEST)


if __name__ == "__main__":
    # deterministic parameter init (matches nn.Parameter(torch.tensor(0.5)))
    alpha = jnp.float32(0.5)

    key = jax.random.PRNGKey(0)
    k1, k2, k3 = jax.random.split(key, 3)
    B, H, S, D = 2, 4, 8, 32
    q = jax.random.normal(k1, (B, H, S, D), dtype=jnp.float32)
    k = jax.random.normal(k2, (B, H, S, D), dtype=jnp.float32)
    v = jax.random.normal(k3, (B, H, S, D), dtype=jnp.float32)

    out = adaptive_attention(q, k, v, alpha)
    jax.block_until_ready(out)

    ref = adaptive_attention_ref(q, k, v, alpha)
    assert out.shape == (B, H, S, D)
    err = float(jnp.max(jnp.abs(out - ref)))
    # Exact divide (no approx reciprocal) -> only matmul/exp rounding remains.
    assert jnp.allclose(out, ref, atol=1e-3, rtol=1e-3), err

    print("KERNEL_OK")
</pallas_src>

<mosaic_0001>
module attributes {stable_mosaic.version = 11 : i64} {
  func.func @_adaptive_attention_kernel(%arg0: i32, %arg1: i32, %arg2: memref<1xf32, #tpu.memory_space<smem>>, %arg3: memref<4x8x32xf32, #tpu.memory_space<vmem>>, %arg4: memref<4x8x32xf32, #tpu.memory_space<vmem>>, %arg5: memref<4x8x32xf32, #tpu.memory_space<vmem>>, %arg6: memref<4x8x32xf32, #tpu.memory_space<vmem>>, %arg7: memref<4x8x1xf32, #tpu.memory_space<vmem>>, %arg8: memref<4x8x1xf32, #tpu.memory_space<vmem>>, %arg9: memref<4x8x32xf32, #tpu.memory_space<vmem>>) attributes {dimension_semantics = [#tpu.dimension_semantics<parallel>, #tpu.dimension_semantics<arbitrary>], iteration_bounds = array<i64: 2, 1>, scalar_prefetch = 0 : i64, scratch_operands = 3 : i64, tpu.core_type = #tpu.core_type<tc>, window_params = [{transform_indices = @transform_0, window_bounds = array<i64: 1>}, {transform_indices = @transform_1, window_bounds = array<i64: 4, 8, 32>}, {transform_indices = @transform_2, window_bounds = array<i64: 4, 8, 32>}, {transform_indices = @transform_3, window_bounds = array<i64: 4, 8, 32>}, {transform_indices = @transform_4, window_bounds = array<i64: 4, 8, 32>}]} {
    %c0_i32 = arith.constant 0 : i32
    %0 = arith.cmpi eq, %arg1, %c0_i32 : i32
    %1 = arith.extui %0 : i1 to i32
    %c0_i32_0 = arith.constant 0 : i32
    %2 = arith.cmpi ne, %1, %c0_i32_0 : i32
    scf.if %2 {
      %cst_36 = arith.constant 0xFF800000 : f32
      %36 = vector.broadcast %cst_36 : f32 to vector<4x8x1xf32>
      %c0_37 = arith.constant 0 : index
      %c0_38 = arith.constant 0 : index
      %c0_39 = arith.constant 0 : index
      %37 = vector.load %arg7[%c0_37, %c0_38, %c0_39] : memref<4x8x1xf32, #tpu.memory_space<vmem>>, vector<4x8x1xf32>
      tpu.vector_store %arg7[%c0_37, %c0_38, %c0_39], %36 {strides = array<i32>} : memref<4x8x1xf32, #tpu.memory_space<vmem>>, vector<4x8x1xf32>,
      %cst_40 = arith.constant 0.000000e+00 : f32
      %38 = vector.broadcast %cst_40 : f32 to vector<4x8x1xf32>
      %c0_41 = arith.constant 0 : index
      %c0_42 = arith.constant 0 : index
      %c0_43 = arith.constant 0 : index
      %39 = vector.load %arg8[%c0_41, %c0_42, %c0_43] : memref<4x8x1xf32, #tpu.memory_space<vmem>>, vector<4x8x1xf32>
      tpu.vector_store %arg8[%c0_41, %c0_42, %c0_43], %38 {strides = array<i32>} : memref<4x8x1xf32, #tpu.memory_space<vmem>>, vector<4x8x1xf32>,
      %cst_44 = arith.constant 0.000000e+00 : f32
      %40 = vector.broadcast %cst_44 : f32 to vector<4x8x32xf32>
      %c0_45 = arith.constant 0 : index
      %c0_46 = arith.constant 0 : index
      %c0_47 = arith.constant 0 : index
      %41 = vector.load %arg9[%c0_45, %c0_46, %c0_47] : memref<4x8x32xf32, #tpu.memory_space<vmem>>, vector<4x8x32xf32>
      tpu.vector_store %arg9[%c0_45, %c0_46, %c0_47], %40 {strides = array<i32>} : memref<4x8x32xf32, #tpu.memory_space<vmem>>, vector<4x8x32xf32>,
    } else {
    }
    %c0 = arith.constant 0 : index
    %3 = memref.load %arg2[%c0] : memref<1xf32, #tpu.memory_space<smem>>
    %c0_1 = arith.constant 0 : index
    %c0_2 = arith.constant 0 : index
    %c0_3 = arith.constant 0 : index
    %4 = vector.load %arg3[%c0_1, %c0_2, %c0_3] : memref<4x8x32xf32, #tpu.memory_space<vmem>>, vector<4x8x32xf32>
    %5 = vector.broadcast %3 : f32 to vector<4x8x32xf32>
    %6 = arith.mulf %4, %5 : vector<4x8x32xf32>
    %c0_4 = arith.constant 0 : index
    %c0_5 = arith.constant 0 : index
    %c0_6 = arith.constant 0 : index
    %7 = vector.load %arg4[%c0_4, %c0_5, %c0_6] : memref<4x8x32xf32, #tpu.memory_space<vmem>>, vector<4x8x32xf32>
    "tpu.trace_start"() <{level = 10 : i32, message = "bqd,bkd->bqk"}> : () -> ()
    %cst = arith.constant dense<0.000000e+00> : vector<4x8x8xf32>
    %8 = tpu.matmul %6, %7, %cst {dimension_numbers = #tpu.dot_dimension_numbers<[2], [2], [1], [1], [0, 0, 0, 1, 1, 1], [0], [0]>} : vector<4x8x32xf32>, vector<4x8x32xf32>, vector<4x8x8xf32> -> vector<4x8x8xf32>
    "tpu.trace_stop"() : () -> ()
    %c0_7 = arith.constant 0 : index
    %c0_8 = arith.constant 0 : index
    %c0_9 = arith.constant 0 : index
    %9 = vector.load %arg7[%c0_7, %c0_8, %c0_9] : memref<4x8x1xf32, #tpu.memory_space<vmem>>, vector<4x8x1xf32>
    %cst_10 = arith.constant dense<0xFF800000> : vector<4x8xf32>
    %10 = vector.multi_reduction <maximumf>, %8, %cst_10 [2] : vector<4x8x8xf32> to vector<4x8xf32>
    %11 = vector.shape_cast %10 : vector<4x8xf32> to vector<4x8x1xf32>
    %12 = arith.maximumf %9, %11 : vector<4x8x1xf32>
    %c0_11 = arith.constant 0 : index
    %c0_12 = arith.constant 0 : index
    %c0_13 = arith.constant 0 : index
    %13 = vector.load %arg7[%c0_11, %c0_12, %c0_13] : memref<4x8x1xf32, #tpu.memory_space<vmem>>, vector<4x8x1xf32>
    %14 = arith.subf %13, %12 : vector<4x8x1xf32>
    %15 = math.exp %14 : vector<4x8x1xf32>
    %16 = vector.broadcast %12 : vector<4x8x1xf32> to vector<4x8x8xf32>
    %17 = arith.subf %8, %16 : vector<4x8x8xf32>
    %18 = math.exp %17 : vector<4x8x8xf32>
    %c0_14 = arith.constant 0 : index
    %c0_15 = arith.constant 0 : index
    %c0_16 = arith.constant 0 : index
    %19 = vector.load %arg8[%c0_14, %c0_15, %c0_16] : memref<4x8x1xf32, #tpu.memory_space<vmem>>, vector<4x8x1xf32>
    %20 = arith.mulf %15, %19 : vector<4x8x1xf32>
    %cst_17 = arith.constant dense<0.000000e+00> : vector<4x8xf32>
    %21 = vector.multi_reduction <add>, %18, %cst_17 [2] : vector<4x8x8xf32> to vector<4x8xf32>
    %22 = vector.shape_cast %21 : vector<4x8xf32> to vector<4x8x1xf32>
    %23 = arith.addf %20, %22 : vector<4x8x1xf32>
    %c0_18 = arith.constant 0 : index
    %c0_19 = arith.constant 0 : index
    %c0_20 = arith.constant 0 : index
    %24 = vector.load %arg8[%c0_18, %c0_19, %c0_20] : memref<4x8x1xf32, #tpu.memory_space<vmem>>, vector<4x8x1xf32>
    tpu.vector_store %arg8[%c0_18, %c0_19, %c0_20], %23 {strides = array<i32>} : memref<4x8x1xf32, #tpu.memory_space<vmem>>, vector<4x8x1xf32>,
    %c0_21 = arith.constant 0 : index
    %c0_22 = arith.constant 0 : index
    %c0_23 = arith.constant 0 : index
    %25 = vector.load %arg9[%c0_21, %c0_22, %c0_23] : memref<4x8x32xf32, #tpu.memory_space<vmem>>, vector<4x8x32xf32>
    %26 = vector.broadcast %15 : vector<4x8x1xf32> to vector<4x8x32xf32>
    %27 = arith.mulf %26, %25 : vector<4x8x32xf32>
    %c0_24 = arith.constant 0 : index
    %c0_25 = arith.constant 0 : index
    %c0_26 = arith.constant 0 : index
    %28 = vector.load %arg5[%c0_24, %c0_25, %c0_26] : memref<4x8x32xf32, #tpu.memory_space<vmem>>, vector<4x8x32xf32>
    "tpu.trace_start"() <{level = 10 : i32, message = "bqk,bkd->bqd"}> : () -> ()
    %cst_27 = arith.constant dense<0.000000e+00> : vector<4x8x32xf32>
    %29 = tpu.matmul %18, %28, %cst_27 {dimension_numbers = #tpu.dot_dimension_numbers<[2], [1], [1], [2], [0, 0, 0, 1, 1, 2], [0], [0]>} : vector<4x8x8xf32>, vector<4x8x32xf32>, vector<4x8x32xf32> -> vector<4x8x32xf32>
    "tpu.trace_stop"() : () -> ()
    %30 = arith.addf %27, %29 : vector<4x8x32xf32>
    %c0_28 = arith.constant 0 : index
    %c0_29 = arith.constant 0 : index
    %c0_30 = arith.constant 0 : index
    %31 = vector.load %arg9[%c0_28, %c0_29, %c0_30] : memref<4x8x32xf32, #tpu.memory_space<vmem>>, vector<4x8x32xf32>
    tpu.vector_store %arg9[%c0_28, %c0_29, %c0_30], %30 {strides = array<i32>} : memref<4x8x32xf32, #tpu.memory_space<vmem>>, vector<4x8x32xf32>,
    %c0_31 = arith.constant 0 : index
    %c0_32 = arith.constant 0 : index
    %c0_33 = arith.constant 0 : index
    %32 = vector.load %arg7[%c0_31, %c0_32, %c0_33] : memref<4x8x1xf32, #tpu.memory_space<vmem>>, vector<4x8x1xf32>
    tpu.vector_store %arg7[%c0_31, %c0_32, %c0_33], %12 {strides = array<i32>} : memref<4x8x1xf32, #tpu.memory_space<vmem>>, vector<4x8x1xf32>,
    %c0_i32_34 = arith.constant 0 : i32
    %33 = arith.cmpi eq, %arg1, %c0_i32_34 : i32
    %34 = arith.extui %33 : i1 to i32
    %c0_i32_35 = arith.constant 0 : i32
    %35 = arith.cmpi ne, %34, %c0_i32_35 : i32
    scf.if %35 {
      %c0_36 = arith.constant 0 : index
      %c0_37 = arith.constant 0 : index
      %c0_38 = arith.constant 0 : index
      %36 = vector.load %arg9[%c0_36, %c0_37, %c0_38] : memref<4x8x32xf32, #tpu.memory_space<vmem>>, vector<4x8x32xf32>
      %c0_39 = arith.constant 0 : index
      %c0_40 = arith.constant 0 : index
      %c0_41 = arith.constant 0 : index
      %37 = vector.load %arg8[%c0_39, %c0_40, %c0_41] : memref<4x8x1xf32, #tpu.memory_space<vmem>>, vector<4x8x1xf32>
      %38 = vector.broadcast %37 : vector<4x8x1xf32> to vector<4x8x32xf32>
      %39 = arith.divf %36, %38 : vector<4x8x32xf32>
      %c0_42 = arith.constant 0 : index
      %c0_43 = arith.constant 0 : index
      %c0_44 = arith.constant 0 : index
      %40 = vector.load %arg6[%c0_42, %c0_43, %c0_44] : memref<4x8x32xf32, #tpu.memory_space<vmem>>, vector<4x8x32xf32>
      tpu.vector_store %arg6[%c0_42, %c0_43, %c0_44], %39 {strides = array<i32>} : memref<4x8x32xf32, #tpu.memory_space<vmem>>, vector<4x8x32xf32>,
    } else {
    }
    return
  }
  func.func @transform_0(%arg0: i32, %arg1: i32) -> i32 {
    %c0_i32 = arith.constant 0 : i32
    %c0_i32_0 = arith.constant 0 : i32
    return %c0_i32 : i32
  }
  func.func @transform_1(%arg0: i32, %arg1: i32) -> (i32, i32, i32) {
    %c0_i32 = arith.constant 0 : i32
    %c0_i32_0 = arith.constant 0 : i32
    %c0_i32_1 = arith.constant 0 : i32
    return %arg0, %c0_i32, %c0_i32_0 : i32, i32, i32
  }
  func.func @transform_2(%arg0: i32, %arg1: i32) -> (i32, i32, i32) {
    %c0_i32 = arith.constant 0 : i32
    %c0_i32_0 = arith.constant 0 : i32
    return %arg0, %arg1, %c0_i32 : i32, i32, i32
  }
  func.func @transform_3(%arg0: i32, %arg1: i32) -> (i32, i32, i32) {
    %c0_i32 = arith.constant 0 : i32
    %c0_i32_0 = arith.constant 0 : i32
    return %arg0, %arg1, %c0_i32 : i32, i32, i32
  }
  func.func @transform_4(%arg0: i32, %arg1: i32) -> (i32, i32, i32) {
    %c0_i32 = arith.constant 0 : i32
    %c0_i32_0 = arith.constant 0 : i32
    %c0_i32_1 = arith.constant 0 : i32
    return %arg0, %c0_i32, %c0_i32_0 : i32, i32, i32
  }
}

</mosaic_0001>

<bundles_post_ra>
// kernel: tpu_custom_call.1
= control target key start
LH: loop header
LB: loop body
LE: loop exit
PB: predicated region body
PF: predicated region fallthrough
CT: control target
= control target key end

     0   :  { %s1533_s0 = inlined_call_operand.<no memory space> [shape: f32[1], index: 0, kind: input, shape index: {}]   ;;  %s1534_s1 = inlined_call_operand.hbm [shape: f32[8,8,32], index: 1, kind: input, shape index: {}]   ;;  %s1535_s2 = inlined_call_operand.hbm [shape: f32[8,8,32], index: 2, kind: input, shape index: {}]   ;;  %s1536_s3 = inlined_call_operand.hbm [shape: f32[8,8,32], index: 3, kind: input, shape index: {}]   ;;  %s1537_s4 = inlined_call_operand.hbm [shape: f32[8,8,32], index: 4, kind: output, shape index: {}]  }
   0x1   :  { %1543 = sst [smem:[#allocation21_spill]] %s1535_s2 }
   0x2   :  { %9 = sst [smem:[#allocation5]] %s1533_s0 }
   0x3   :  { %10 = vsyncpa [#allocation7], 0 }
   0x4   :  { %12 = vsyncpa [#allocation7 + $0x1], 0 }
   0x5   :  { %13 = vsyncpa [#allocation10], 0 }
   0x6   :  { %15 = vsyncpa [#allocation10 + $0x1], 0 }
   0x7   :  { %16 = vsyncpa [#allocation8], 0 }
   0x8   :  { %18 = vsyncpa [#allocation8 + $0x1], 0  ;;  %s1286_s17 = smov 0   ;;  %s1288_s18 = smov 0  }
   0x9   :  { %s1290_s19 = smov 0   ;;  %s1292_s20 = smov 0  }
   0xa   :  { %s1294_s21 = smov 0   ;;  %s1296_s22 = smov 0  }
   0xb LB: > { %1544 = sst [smem:[#allocation16_spill]] %s1237_s19  ;;  %s1317_s0 = sadd.s32 4294967295, %s1249_s22   ;;  %s1249_s22 = sphi %s1296_s22, %s24_s22   ;;  %s1245_s21 = sphi %s1294_s21, %s1560_s21   ;;  %s1241_s20 = sphi %s1292_s20, %s1559_s20   ;;  %s1237_s19 = sphi %s1290_s19, %s1558_s19   ;;  %s1233_s18 = sphi %s1288_s18, %s1562_s18   ;;  %s1229_s17 = sphi %s1286_s17, %s1561_s17  }
   0xc   : > { %1545 = sst [smem:[#allocation17_spill]] %s1245_s21  ;;  %s929_s23 = sadd.s32 4294967294, %s1249_s22  }
   0xd   : > { %1546 = sst [smem:[#allocation18_spill]] %s1249_s22  ;;  %s36_s24 = sadd.s32 1, %s1245_s21 }
   0xe   : > { %s64_s25 = sadd.s32 1, %s1237_s19  ;;  %p38_p0 = scmp.ge.s32.totalorder %s36_s24, 2 }
   0xf   : > { %p71_p1 = scmp.ne.s32.totalorder %s1237_s19, %s1233_s18  ;;  %p72_p2 = scmp.eq.s32.totalorder %s1249_s22, 0 }
  0x10   : > { %p77_p3 = scmp.ne.s32.totalorder %s1233_s18, %s1229_s17  ;;  %s1564_s24 = smov (%p38_p0, %s36_s24), 0 }
  0x11   : > { %1547 = sst [smem:[#allocation19_spill]] %s1564_s24  ;;  %p1329_p4 = por %p72_p2, %p71_p1 }
  0x12   : > { %p78_p5 = scmp.eq.s32.totalorder %s1317_s0, 0  ;;  %s61_s27 = ssub.s32 %s1245_s21, %s1564_s24 }
  0x13   : > { %p157_p6 = scmp.eq.s32.totalorder %s1317_s0, 1  ;;  %p62_p7 = scmp.eq.s32.totalorder %s61_s27, 0 }
  0x14   : > { %p1337_p8 = por %p78_p5, %p77_p3  ;;  %p163_p10 = scmp.eq.s32.totalorder %s929_s23, 1 }
  0x15   : > { %p1341_p9 = por %p157_p6, %p71_p1  ;;  %p931_p12 = scmp.ge.s32.totalorder %s1249_s22, 2 }
  0x16   : > { %s1346_s30 = scalar_select %p62_p7, %s1237_s19, %s64_s25  }
  0x17   : > { %p1348_p11 = por %p163_p10, %p77_p3  ;;  %p989_p13 = scmp.lt.s32.totalorder %s1249_s22, 2 }
  0x18   : > { %1551 = sst [smem:[#allocation20_spill]] %s1346_s30  ;;  %s186_s6 = sand.u32 1, %s1237_s19  }
  0x19   : > { %s1355_s7 = sshll.u32 %s186_s6, 5  ;;  %s963_s8 = sshll.u32 %s1245_s21, 5 }
  0x1a   : > { %p1360_p0 = pnand %p989_p13, %p1329_p4  ;;  %s208_s10 = sand.u32 1, %s1249_s22  }
  0x1b   : > { %s1554_s2 = sld [smem:[#allocation21_spill]]  ;;  %s212_s15 = scalar_lea.vmem [#allocation9], %s1355_s7 }
  0x1c   : > { %s221_s16 = sshll.u32 %s212_s15, 4  ;;  %s209_s23 = scalar_lea.sflag [#allocation10], %s208_s10  ;;  %s222_s16 = int_to_ptr.vmem [resolvable:$true] %s221_s16 }
  0x1d   : > { %s1251_s25 = smov 128   ;;  %s1252_s26 = smov 8  }
  0x1e   : > { %p941_p1 = scmp.ge.s32.totalorder %s1249_s22, 1  ;;  %p252_p2 = scmp.lt.s32.totalorder %s1249_s22, 3 }
  0x1f   : > { %s187_s10 = scalar_lea.sflag [#allocation7], %s186_s6  ;;  %s241_s21 = scalar_lea.hbm %s1536_s3, %s963_s8 }
  0x20   : > { %p1373_p3 = pnand %p941_p1, %p252_p2  ;;  %s242_s30 = sshll.u32 %s241_s21, 4  ;;  %s243_s30 = int_to_ptr.hbm [resolvable:$true] %s242_s30 }
  0x21   : > { %s218_s13 = scalar_lea.hbm %s1554_s2, %s963_s8  ;;  %s190_s2 = scalar_lea.vmem [#allocation6], %s1355_s7 }
  0x22   : > { %s219_s14 = sshll.u32 %s218_s13, 4  ;;  %s195_s13 = scalar_lea.hbm %s1534_s1, %s963_s8  ;;  %s220_s14 = int_to_ptr.hbm [resolvable:$true] %s219_s14 }
  0x23   : > { %981 = dma.hbm_to_vmem [thread:$0]  (!%p1360_p0), %s220_s14, 512, %s222_s16, %s209_s23, %s1251_s25, %s1251_s25, %s1252_s26  }
  0x24   : > { %s196_s15 = sshll.u32 %s195_s13, 4  ;;  %s198_s24 = sshll.u32 %s190_s2, 4  ;;  %s197_s15 = int_to_ptr.hbm [resolvable:$true] %s196_s15  ;;  %s199_s24 = int_to_ptr.vmem [resolvable:$true] %s198_s24 }
  0x25   : > { %978 = dma.hbm_to_vmem [thread:$0]  (!%p1360_p0), %s197_s15, 512, %s199_s24, %s187_s10, %s1251_s25, %s1251_s25, %s1252_s26  }
  0x26   : > { %s235_s19 = scalar_lea.vmem [#allocation11], %s1355_s7  ;;  %256 = sbr.rel (%p1373_p3) target bundleno = 736 (0x2e0), region = 36 }
  0x27   : > { %s244_s22 = sshll.u32 %s235_s19, 4  ;;  %s1392_s2 = sand.u32 (!%p1373_p3), 1, %s1233_s18   ;;  %s245_s22 = int_to_ptr.vmem [resolvable:$true] %s244_s22 }
  0x28   : > { %984 = dma.hbm_to_vmem [thread:$0]  (!%p1360_p0), %s243_s30, 512, %s245_s22, %s209_s23, %s1251_s25, %s1251_s25, %s1252_s26  }
  0x29   : > { %s1395_s24 = sshll.u32 (!%p1373_p3), %s1392_s2, 5  ;;  %s259_s6 = scalar_lea.sflag (!%p1373_p3), [#allocation7], %s1392_s2 }
  0x2a   : > { %s262_s21 = scalar_lea.vmem (!%p1373_p3), [#allocation6], %s1395_s24 }
  0x2b   : > { %1216 = dma.done.wait (%p1337_p8), %s259_s6, 512  }
  0x2c   : > { %1218 = vsyncadd (%p1337_p8), %s259_s6, 4294966784  ;;  %s268_s19 = sand.u32 1, %s1317_s0   ;;  %s272_s30 = scalar_lea.vmem [#allocation9], %s1395_s24 }
  0x2d   : > { %s269_s22 = scalar_lea.sflag [#allocation10], %s268_s19 }
  0x2e   : > { %1220 = dma.done.wait (%p1337_p8), %s269_s22, 1024  }
  0x2f   : > { %1222 = vsyncadd (%p1337_p8), %s269_s22, 4294966272  ;;  %s340_s7 = sld [smem:[#allocation5]]  ;;  %vm335_vm0 = vcmask 261120   ;;  %v350_v0 = vld [vmem:[%s272_s30] sm:$0xff]  ;;  %v352_v1 = vld [vmem:[%s272_s30 + $0x10] sm:$0xff]  ;;  %vm326_vm1 = vcmask 7168  }
  0x30   : > { %v341_v2 = vld [vmem:[%s262_s21] sm:$0xff]  ;;  %946 = vmatpush.xpose.msk.msra.mxu0 %vm335_vm0, %v350_v0  ;;  %950 = vmatpush.xpose.msk.msra.mxu2 %vm335_vm0, %v352_v1  ;;  %v343_v5 = vld [vmem:[%s262_s21 + $0x10] sm:$0xff]  ;;  %v351_v6 = vld [vmem:[%s272_s30 + $0x8] sm:$0xff]  ;;  %v1253_v13 = vmov -inf   ;;  %vm463_vm2 = vcmask 64512   ;;  %v1254_v22 = vmov 0  }
  0x31   : > { %v353_v7 = vld [vmem:[%s272_s30 + $0x18] sm:$0xff]  ;;  %948 = vmatpush.xpose.msk.msra.mxu1 %vm335_vm0, %v351_v6  ;;  %v342_v9 = vld [vmem:[%s262_s21 + $0x8] sm:$0xff]  ;;  %327 = vst.msk [vmem:[#allocation2] sm:$0xff] %vm326_vm1, %v1253_v13  ;;  %1046 = vset.pattern.permute.xlu0 %v1254_v22  ;;  %v1255_v23 = vmov 0.0   ;;  %s282_s0 = scalar_lea.vmem [#allocation11], %s1395_s24  ;;  %s1482_s28 = scalar_lea.vmem [#allocation12], %s1395_s24 }
  0x32   : > { %952 = vmatpush.xpose.msk.msra.mxu3 %vm335_vm0, %v353_v7  ;;  %v344_v10 = vld [vmem:[%s262_s21 + $0x18] sm:$0xff]  ;;  %328 = vst.msk [vmem:[#allocation2 + $0x8] sm:$0xff] %vm326_vm1, %v1253_v13  ;;  %1048 = vset.pattern.permute.xlu2 %v1254_v22  ;;  %v583_v40 = vld [vmem:[%s282_s0 + $0x10] sm:$0xff]  ;;  %v581_v42 = vld [vmem:[%s282_s0] sm:$0xff]  ;;  %s966_s8 = sshll.u32 %s1241_s20, 5  ;;  %s797_s26 = sshll.u32 %s1482_s28, 4  ;;  %s798_s26 = int_to_ptr.vmem [resolvable:$true] %s797_s26 }
  0x33   : > { %329 = vst.msk [vmem:[#allocation2 + $0x10] sm:$0xff] %vm326_vm1, %v1253_v13  ;;  %1047 = vset.pattern.permute.xlu1 %v1254_v22  ;;  %v584_v41 = vld [vmem:[%s282_s0 + $0x18] sm:$0xff]  ;;  %v582_v45 = vld [vmem:[%s282_s0 + $0x8] sm:$0xff]  ;;  %s796_s25 = scalar_lea.hbm %s1537_s4, %s966_s8  ;;  %s785_s20 = scalar_lea.sflag [#allocation8], %s1392_s2 }
  0x34   : > { %330 = vst.msk [vmem:[#allocation2 + $0x18] sm:$0xff] %vm326_vm1, %v1253_v13  ;;  %649 = vmatpush.msrb.mxu2 %v583_v40  ;;  %603 = vmatpush.msrb.mxu0 %v581_v42  ;;  %s799_s27 = sshll.u32 %s796_s25, 4  ;;  %s1183_s10 = scalar_lea.hbm %s1537_s4, 64  ;;  %s800_s27 = int_to_ptr.hbm [resolvable:$true] %s799_s27 }
  0x35   : > { %v345_v3 = vstv %s340_s7  ;;  %333 = vst.msk [vmem:[#allocation3 + $0x10] sm:$0xff] %vm326_vm1, %v1255_v23  ;;  %626 = vmatpush.msrb.mxu1 %v582_v45  ;;  %s1177_s11 = sshra.s32 %s800_s27, 4  ;;  %s1178_s11 = int_to_ptr.hbm [resolvable:$true] %s1177_s11 }
  0x36   : > { %v346_v4 = vmul.f32 %v345_v3, %v341_v2  ;;  %v348_v8 = vmul.f32 %v345_v3, %v343_v5  ;;  %v347_v11 = vmul.f32 %v345_v3, %v342_v9  ;;  %v349_v12 = vmul.f32 %v345_v3, %v344_v10  ;;  %331 = vst.msk [vmem:[#allocation3] sm:$0xff] %vm326_vm1, %v1255_v23  ;;  %s1179_s12 = scalar_lea.hbm %s1178_s11, 32  ;;  %p1184_p7 = scmp.lt.s32.totalorder %s1178_s11, %s1537_s4 }
  0x37   : > { %332 = vst.msk [vmem:[#allocation3 + $0x8] sm:$0xff] %vm326_vm1, %v1255_v23  ;;  %672 = vmatpush.msrb.mxu3 %v584_v41  ;;  %p1180_p4 = scmp.ne.s32.totalorder %s1178_s11, %s1179_s12  ;;  %p1185_p8 = scmp.lt.s32.totalorder %s1183_s10, %s1179_s12 }
  0x38   : > { %947 = vmatmul.msk.f32.vlgmr.msra.gmra.mxu0 %vm335_vm0, %v346_v4  ;;  %951 = vmatmul.msk.f32.vlgmr.msra.gmra.mxu2 %vm335_vm0, %v348_v8  ;;  %334 = vst.msk [vmem:[#allocation3 + $0x18] sm:$0xff] %vm326_vm1, %v1255_v23  ;;  %v459_v24 = vld [vmem:[#allocation2] sm:$0xff] }
  0x39   : > { %949 = vmatmul.msk.f32.vlgmr.msra.gmra.mxu1 %vm335_vm0, %v347_v11  ;;  %953 = vmatmul.msk.f32.vlgmr.msra.gmra.mxu3 %vm335_vm0, %v349_v12  ;;  %336 = vst.msk [vmem:[#allocation4] sm:$0xff] %vm335_vm0, %v1255_v23  ;;  %v460_v30 = vld [vmem:[#allocation2 + $0x8] sm:$0xff]  ;;  %p1181_p5 = pnand %p1180_p4, %p1341_p9  ;;  %p1186_p10 = por %p1185_p8, %p1184_p7 }
  0x3a   : > { %337 = vst.msk [vmem:[#allocation4 + $0x8] sm:$0xff] %vm335_vm0, %v1255_v23  ;;  %v1440_v28 = vld [vmem:[#allocation2 + $0x10] sm:$0xff] }
  0x3b   : > { %338 = vst.msk [vmem:[#allocation4 + $0x10] sm:$0xff] %vm335_vm0, %v1255_v23  ;;  %v1451_v36 = vld [vmem:[#allocation2 + $0x18] sm:$0xff]  ;;  %p1182_p6 = pneg %p1181_p5 }
  0x3c   : > { %339 = vst.msk [vmem:[#allocation4 + $0x18] sm:$0xff] %vm335_vm0, %v1255_v23  ;;  %v526_v6 = vld [vmem:[#allocation3 + $0x10] sm:$0xff] }
  0x3d   : > { %v524_v10 = vld [vmem:[#allocation3] sm:$0xff]  ;;  %p1187_p13 = pnand %p1186_p10, %p1182_p6 }
  0xb5   : > { %v1421_v14 = vpop.f32.mrf.mxu0 }
  0xb6   : > { %v464_v15 = vsel %vm463_vm2, %v1421_v14, -inf  ;;  %v1425_v16 = vpop.f32.mrf.mxu1 }
  0xb7   : > { %465 = vmax.xlane.f32.xlu1 %v464_v15  ;;  %v467_v19 = vsel %vm463_vm2, %v1425_v16, -inf  ;;  %v553_v15 = vld [vmem:[#allocation4] sm:$0xff] }
  0xbb   : > { %v430_v17 = vpop.f32.mrf.mxu2 }
  0xbc   : > { %v470_v18 = vsel %vm463_vm2, %v430_v17, -inf  ;;  %v456_v20 = vpop.f32.mrf.mxu3 }
  0xbd   : > { %471 = vmax.xlane.f32.xlu0 %v470_v18  ;;  %v473_v21 = vsel %vm463_vm2, %v456_v20, -inf }
  0xbf   : > { %468 = vmax.xlane.f32.xlu1 %v467_v19 }
  0xc5   : > { %474 = vmax.xlane.f32.xlu0 %v473_v21 }
 0x12a   : > { %v466_v25 = vpop.xlane.xlu1 %465 }
 0x12b   : > { %v476_v26 = vmax.f32 %v459_v24, %v466_v25 }
 0x12d   : > { %v480_v27 = vsub.f32 %v459_v24, %v476_v26  ;;  %685 = vst.msk [vmem:[#allocation2] sm:$0xff] %vm326_vm1, %v476_v26  ;;  %494 = vperm.xlu0 %1046, %v476_v26   ;;  %v554_v24 = vld [vmem:[#allocation4 + $0x8] sm:$0xff] }
 0x12f   : > { %v484_v56 = vmul.f32 1.442695, %v480_v27 }
 0x130   : > { %v472_v29 = vpop.xlane.xlu0 %471 }
 0x131   : > { %v1443_v31 = vmax.f32 %v1440_v28, %v472_v29 }
 0x132   : > { %v469_v32 = vpop.xlane.xlu1 %468 }
 0x133   : > { %v482_v33 = vsub.f32 %v1440_v28, %v1443_v31  ;;  %687 = vst.msk [vmem:[#allocation2 + $0x10] sm:$0xff] %vm326_vm1, %v1443_v31  ;;  %v477_v34 = vmax.f32 %v460_v30, %v469_v32  ;;  %504 = vperm.xlu2 %1048, %v1443_v31  }
 0x135   : > { %v481_v35 = vsub.f32 %v460_v30, %v477_v34  ;;  %686 = vst.msk [vmem:[#allocation2 + $0x8] sm:$0xff] %vm326_vm1, %v477_v34  ;;  %499 = vperm.xlu1 %1047, %v477_v34   ;;  %v488_v4 = vmul.f32 1.442695, %v482_v33  ;;  %v527_v33 = vld [vmem:[#allocation3 + $0x18] sm:$0xff] }
 0x137   : > { %v486_v1 = vmul.f32 1.442695, %v481_v35 }
 0x138   : > { %v475_v37 = vpop.xlane.xlu0 %474 }
 0x139   : > { %v1454_v38 = vmax.f32 %v1451_v36, %v475_v37 }
 0x13b   : > { %v483_v39 = vsub.f32 %v1451_v36, %v1454_v38  ;;  %688 = vst.msk [vmem:[#allocation2 + $0x18] sm:$0xff] %vm326_vm1, %v1454_v38  ;;  %509 = vperm.xlu2 %1048, %v1454_v38  }
 0x13d   : > { %v490_v31 = vmul.f32 1.442695, %v483_v39 }
 0x18d   : > { %v505_v43 = vpop.permute.xlu2 %504 }
 0x18e   : > { %v514_v44 = vsub.f32 %v430_v17, %v505_v43 }
 0x190   : > { %v520_v46 = vmul.f32 1.442695, %v514_v44 }
 0x192   : > { %1049 = vpow2.f32 %v520_v46 }
 0x195   : > { %v510_v47 = vpop.permute.xlu2 %509 }
 0x196   : > { %v515_v48 = vsub.f32 %v456_v20, %v510_v47 }
 0x198   : > { %v1050_v49 = vpop.eup %1049  ;;  %v522_v50 = vmul.f32 1.442695, %v515_v48 }
 0x199   : > { %956 = vmatmul.msk.f32.vlgmr.msrb.gmra.mxu2 %vm463_vm2, %v1050_v49  ;;  %v538_v51 = vsel %vm463_vm2, %v1050_v49, 0.0 }
 0x19a   : > { %1051 = vpow2.f32 %v522_v50  ;;  %539 = vadd.xlane.f32.xlu0 %v538_v51 }
 0x19f   : > { %v495_v52 = vpop.permute.xlu0 %494 }
 0x1a0   : > { %v1052_v53 = vpop.eup %1051  ;;  %v512_v54 = vsub.f32 %v1421_v14, %v495_v52  ;;  %v525_v14 = vld [vmem:[#allocation3 + $0x8] sm:$0xff] }
 0x1a1   : > { %957 = vmatmul.msk.f32.vlgmr.msrb.gmra.mxu3 %vm463_vm2, %v1052_v53  ;;  %v541_v3 = vsel %vm463_vm2, %v1052_v53, 0.0 }
 0x1a2   : > { %v516_v55 = vmul.f32 1.442695, %v512_v54 }
 0x1a4   : > { %1053 = vpow2.f32 %v516_v55 }
 0x1a5   : > { %1055 = vpow2.f32 %v484_v56  ;;  %v555_v56 = vld [vmem:[#allocation4 + $0x10] sm:$0xff] }
 0x1a7   : > { %v500_v57 = vpop.permute.xlu1 %499 }
 0x1a8   : > { %v513_v58 = vsub.f32 %v1425_v16, %v500_v57 }
 0x1aa   : > { %v1054_v59 = vpop.eup %1053  ;;  %v518_v60 = vmul.f32 1.442695, %v513_v58 }
 0x1ab   : > { %954 = vmatmul.msk.f32.vlgmr.msrb.gmra.mxu0 %vm463_vm2, %v1054_v59  ;;  %v532_v61 = vsel %vm463_vm2, %v1054_v59, 0.0  ;;  %v1056_v62 = vpop.eup %1055 }
 0x1ac   : > { %1057 = vpow2.f32 %v518_v60  ;;  %533 = vadd.xlane.f32.xlu2 %v532_v61  ;;  %v528_v11 = vmul.f32 %v1056_v62, %v524_v10 }
 0x1ad   : > { %1059 = vpow2.f32 %v486_v1 }
 0x1ae   : > { %559 = vperm.xlu0 %1046, %v1056_v62   ;;  %1061 = vpow2.f32 %v488_v4 }
 0x1af   : > { %1063 = vpow2.f32 %v490_v31 }
 0x1b2   : > { %v1058_v63 = vpop.eup %1057 }
 0x1b3   : > { %955 = vmatmul.msk.f32.vlgmr.msrb.gmra.mxu1 %vm463_vm2, %v1058_v63  ;;  %v535_v0 = vsel %vm463_vm2, %v1058_v63, 0.0  ;;  %v1060_v2 = vpop.eup %1059 }
 0x1b4   : > { %536 = vadd.xlane.f32.xlu1 %v535_v0  ;;  %v1062_v5 = vpop.eup %1061  ;;  %v529_v17 = vmul.f32 %v1060_v2, %v525_v14 }
 0x1b5   : > { %v530_v7 = vmul.f32 %v1062_v5, %v526_v6  ;;  %v1064_v32 = vpop.eup %1063 }
 0x1b6   : > { %v531_v34 = vmul.f32 %v1064_v32, %v527_v33 }
 0x1c4   : > { %564 = vperm.xlu2 %1048, %v1060_v2  }
 0x1ed   : > { %542 = vadd.xlane.f32.xlu2 %v541_v3 }
 0x20d   : > { %v540_v8 = vpop.xlane.xlu0 %539 }
 0x20e   : > { %v546_v9 = vadd.f32 %v540_v8, %v530_v7 }
 0x210   : > { %551 = vst.msk [vmem:[#allocation3 + $0x10] sm:$0xff] %vm326_vm1, %v546_v9 }
 0x217   : > { %v698_v30 = vld [vmem:[#allocation3 + $0x10] sm:$0xff] }
 0x21c   : > { %v651_v62 = vpop.f32.mrf.mxu2 }
 0x21f   : > { %v534_v12 = vpop.xlane.xlu2 %533 }
 0x220   : > { %v544_v13 = vadd.f32 %v534_v12, %v528_v11  ;;  %v560_v16 = vpop.permute.xlu0 %559 }
 0x221   : > { %v577_v18 = vmul.f32 %v560_v16, %v553_v15 }
 0x222   : > { %549 = vst.msk [vmem:[#allocation3] sm:$0xff] %vm326_vm1, %v544_v13 }
 0x227   : > { %v537_v19 = vpop.xlane.xlu1 %536  ;;  %v565_v25 = vpop.permute.xlu2 %564 }
 0x228   : > { %v545_v20 = vadd.f32 %v537_v19, %v529_v17  ;;  %v605_v21 = vpop.f32.mrf.mxu0  ;;  %v578_v26 = vmul.f32 %v565_v25, %v554_v24  ;;  %v556_v19 = vld [vmem:[#allocation4 + $0x18] sm:$0xff]  ;;  %v674_v24 = vpop.f32.mrf.mxu3 }
 0x229   : > { %v677_v22 = vadd.f32 %v605_v21, %v577_v18  ;;  %v696_v23 = vld [vmem:[#allocation3] sm:$0xff] }
 0x22a   : > { %550 = vst.msk [vmem:[#allocation3 + $0x8] sm:$0xff] %vm326_vm1, %v545_v20  ;;  %702 = vperm.xlu2 %1048, %v696_v23  }
 0x22b   : > { %681 = vst.msk [vmem:[#allocation4] sm:$0xff] %vm335_vm0, %v677_v22 }
 0x230   : > { %v628_v27 = vpop.f32.mrf.mxu1 }
 0x231   : > { %v678_v28 = vadd.f32 %v628_v27, %v578_v26  ;;  %v697_v29 = vld [vmem:[#allocation3 + $0x8] sm:$0xff] }
 0x232   : > { %707 = vperm.xlu1 %1047, %v697_v29   ;;  %712 = vperm.xlu2 %1048, %v698_v30   ;;  %v692_v48 = vld [vmem:[#allocation4] sm:$0xff] }
 0x233   : > { %682 = vst.msk [vmem:[#allocation4 + $0x8] sm:$0xff] %vm335_vm0, %v678_v28 }
 0x23a   : > { %569 = vperm.xlu1 %1047, %v1062_v5   ;;  %v693_v11 = vld [vmem:[#allocation4 + $0x8] sm:$0xff] }
 0x260   : > { %v543_v35 = vpop.xlane.xlu2 %542 }
 0x261   : > { %v547_v37 = vadd.f32 %v543_v35, %v531_v34 }
 0x263   : > { %552 = vst.msk [vmem:[#allocation3 + $0x18] sm:$0xff] %vm326_vm1, %v547_v37 }
 0x26a   : > { %v699_v40 = vld [vmem:[#allocation3 + $0x18] sm:$0xff] }
 0x26b   : > { %717 = vperm.xlu2 %1048, %v699_v40  }
 0x273   : > { %574 = vperm.xlu2 %1048, %v1064_v32  }
 0x284   : > { %v703_v41 = vpop.permute.xlu2 %702 }
 0x285   : > { %1065 = vrcp.f32 %v703_v41  ;;  %v731_v45 = vand.u32 2147483648, %v703_v41  ;;  %v729_v38 = vand.u32 2147483647, %v703_v41  ;;  %vm725_vm4 = vweird.f32 %v703_v41 }
 0x287   : > { %v732_v46 = vor.u32 1.1754944e-38, %v731_v45  ;;  %vm730_vm6 = vcmp.eq.f32.partialorder %v729_v38, 8.507059e+37 }
 0x28b   : > { %v1066_v42 = vpop.eup %1065 }
 0x28c   : > { %v721_v43 = vmul.f32 %v1066_v42, %v703_v41  ;;  %vm726_vm3 = vweird.f32 %v1066_v42  ;;  %v713_v51 = vpop.permute.xlu2 %712 }
 0x28d   : > { %vm727_vm5 = vmor %vm725_vm4, %vm726_vm3  ;;  %1067 = vrcp.f32 %v713_v51  ;;  %v761_v5 = vand.u32 2147483648, %v713_v51  ;;  %vm755_vm10 = vweird.f32 %v713_v51  ;;  %v759_v7 = vand.u32 2147483647, %v713_v51 }
 0x28e   : > { %v722_v44 = vsub.f32 1.0, %v721_v43 }
 0x28f   : > { %v762_v13 = vor.u32 1.1754944e-38, %v761_v5  ;;  %vm760_vm14 = vcmp.eq.f32.partialorder %v759_v7, 8.507059e+37 }
 0x290   : > { %v723_v36 = vmul.f32 %v1066_v42, %v722_v44 }
 0x292   : > { %v724_v39 = vadd.f32 %v1066_v42, %v723_v36 }
 0x293   : > { %v1068_v52 = vpop.eup %1067 }
 0x294   : > { %v728_v47 = vsel %vm727_vm5, %v1066_v42, %v724_v39  ;;  %v751_v54 = vmul.f32 %v1068_v52, %v713_v51  ;;  %vm756_vm8 = vweird.f32 %v1068_v52 }
 0x295   : > { %v733_v49 = vsel %vm730_vm6, %v732_v46, %v728_v47  ;;  %vm757_vm12 = vmor %vm755_vm10, %vm756_vm8 }
 0x296   : > { %v734_v50 = vmul.f32 %v733_v49, %v692_v48  ;;  %v752_v55 = vsub.f32 1.0, %v751_v54 }
 0x298   : > { %780 = vst.msk [vmem:[%s1482_s28] sm:$0xff] %vm335_vm0, %v734_v50  ;;  %v753_v60 = vmul.f32 %v1068_v52, %v752_v55 }
 0x29a   : > { %v754_v4 = vadd.f32 %v1068_v52, %v753_v60 }
 0x29c   : > { %v758_v10 = vsel %vm757_vm12, %v1068_v52, %v754_v4 }
 0x29d   : > { %v763_v15 = vsel %vm760_vm14, %v762_v13, %v758_v10 }
 0x2a4   : > { %v708_v53 = vpop.permute.xlu1 %707 }
 0x2a5   : > { %1069 = vrcp.f32 %v708_v53  ;;  %v746_v0 = vand.u32 2147483648, %v708_v53  ;;  %v744_v3 = vand.u32 2147483647, %v708_v53  ;;  %vm740_vm9 = vweird.f32 %v708_v53 }
 0x2a7   : > { %v747_v8 = vor.u32 1.1754944e-38, %v746_v0  ;;  %vm745_vm13 = vcmp.eq.f32.partialorder %v744_v3, 8.507059e+37 }
 0x2ab   : > { %v1070_v57 = vpop.eup %1069 }
 0x2ac   : > { %v736_v58 = vmul.f32 %v1070_v57, %v708_v53  ;;  %v570_v59 = vpop.permute.xlu1 %569  ;;  %vm741_vm7 = vweird.f32 %v1070_v57 }
 0x2ad   : > { %v579_v61 = vmul.f32 %v570_v59, %v555_v56  ;;  %vm742_vm11 = vmor %vm740_vm9, %vm741_vm7 }
 0x2ae   : > { %v737_v63 = vsub.f32 1.0, %v736_v58 }
 0x2af   : > { %v679_v1 = vadd.f32 %v651_v62, %v579_v61 }
 0x2b0   : > { %v738_v2 = vmul.f32 %v1070_v57, %v737_v63 }
 0x2b1   : > { %683 = vst.msk [vmem:[#allocation4 + $0x10] sm:$0xff] %vm335_vm0, %v679_v1 }
 0x2b2   : > { %v739_v6 = vadd.f32 %v1070_v57, %v738_v2 }
 0x2b4   : > { %v743_v9 = vsel %vm742_vm11, %v1070_v57, %v739_v6 }
 0x2b5   : > { %v748_v12 = vsel %vm745_vm13, %v747_v8, %v743_v9 }
 0x2b6   : > { %v749_v14 = vmul.f32 %v748_v12, %v693_v11 }
 0x2b8   : > { %781 = vst.msk [vmem:[%s1482_s28 + $0x8] sm:$0xff] %vm335_vm0, %v749_v14  ;;  %v694_v16 = vld [vmem:[#allocation4 + $0x10] sm:$0xff] }
 0x2b9   : > { %v764_v17 = vmul.f32 %v763_v15, %v694_v16 }
 0x2bb   : > { %782 = vst.msk [vmem:[%s1482_s28 + $0x10] sm:$0xff] %vm335_vm0, %v764_v17 }
 0x2c5   : > { %v718_v18 = vpop.permute.xlu2 %717 }
 0x2c6   : > { %1071 = vrcp.f32 %v718_v18  ;;  %v776_v29 = vand.u32 2147483648, %v718_v18  ;;  %vm770_vm1 = vweird.f32 %v718_v18  ;;  %v774_v30 = vand.u32 2147483647, %v718_v18 }
 0x2c8   : > { %v777_v32 = vor.u32 1.1754944e-38, %v776_v29  ;;  %vm775_vm3 = vcmp.eq.f32.partialorder %v774_v30, 8.507059e+37 }
 0x2cc   : > { %v1072_v20 = vpop.eup %1071 }
 0x2cd   : > { %v766_v21 = vmul.f32 %v1072_v20, %v718_v18  ;;  %v575_v22 = vpop.permute.xlu2 %574  ;;  %vm771_vm15 = vweird.f32 %v1072_v20 }
 0x2ce   : > { %v580_v23 = vmul.f32 %v575_v22, %v556_v19  ;;  %vm772_vm2 = vmor %vm770_vm1, %vm771_vm15 }
 0x2cf   : > { %v767_v25 = vsub.f32 1.0, %v766_v21 }
 0x2d0   : > { %v680_v26 = vadd.f32 %v674_v24, %v580_v23 }
 0x2d1   : > { %v768_v27 = vmul.f32 %v1072_v20, %v767_v25 }
 0x2d2   : > { %684 = vst.msk [vmem:[#allocation4 + $0x18] sm:$0xff] %vm335_vm0, %v680_v26 }
 0x2d3   : > { %v769_v28 = vadd.f32 %v1072_v20, %v768_v27 }
 0x2d5   : > { %v773_v31 = vsel %vm772_vm2, %v1072_v20, %v769_v28 }
 0x2d6   : > { %v778_v33 = vsel %vm775_vm3, %v777_v32, %v773_v31 }
 0x2d9   : > { %v695_v34 = vld [vmem:[#allocation4 + $0x18] sm:$0xff] }
 0x2da   : > { %v779_v35 = vmul.f32 %v778_v33, %v695_v34 }
 0x2dc   : > { %783 = vst.msk [vmem:[%s1482_s28 + $0x18] sm:$0xff] %vm335_vm0, %v779_v35 }
 0x2dd   : > { %1190 = shalt.err (!%p1187_p13)
}
 0x2de   : > { %s1256_s2 = smov 128   ;;  %s1257_s24 = smov 8  }
 0x2df   : > { %973 = dma.vmem_to_hbm [thread:$0]  (%p1341_p9), %s798_s26, 512, %s800_s27, %s785_s20, %s1256_s2, %s1256_s2, %s1257_s24  }
 0x2e0 PF: > { %s1556_s6 = sld [smem:[#allocation18_spill]]  ;;  %s814_s21 = sand.u32 1, %s1229_s17  }
 0x2e1   : > { %p986_p0 = pnand %p931_p12, %p1348_p11  ;;  %s815_s19 = scalar_lea.sflag [#allocation8], %s814_s21 }
 0x2e3   : > { %p987_p1 = pneg %p986_p0 }
 0x2e5   : > { %1224 = dma.done.wait (%p987_p1), %s815_s19, 512  }
 0x2e6   : > { %1226 = vsyncadd (%p987_p1), %s815_s19, 4294966784  ;;  %s24_s22 = sadd.s32 1, %s1556_s6   ;;  %s1557_s30 = sld [smem:[#allocation16_spill]] }
 0x2e7   : > { %p21_p2 = scmp.ge.s32.totalorder %s24_s22, 4   ;;  %s1558_s19 = sld [smem:[#allocation20_spill]] }
 0x2e8   : > { %s1559_s20 = sld [smem:[#allocation17_spill]]  ;;  %s1561_s17 = smov %s1233_s18 }
 0x2e9   : > { %s1560_s21 = sld [smem:[#allocation19_spill]]  ;;  %23 = sbr.rel (!%p21_p2) target bundleno = 11 (0xb), region = 113 }
 0x2ec   : > { %s1562_s18 = smov %s1557_s30 }
 0x2ee   :  { %821 = vsyncpa [#allocation7], 1 }
 0x2ef   :  { %823 = vsyncpa [#allocation7 + $0x1], 1 }
 0x2f0   :  { %824 = vsyncpa [#allocation10], 1 }
 0x2f1   :  { %826 = vsyncpa [#allocation10 + $0x1], 1 }
 0x2f2   :  { %827 = vsyncpa [#allocation8], 1 }
 0x2f3   :  { %829 = vsyncpa [#allocation8 + $0x1], 1 }

</bundles_post_ra>
